<compile_context>
chip_gen: v7x
topology: tpu7x:2x2x1
jax: 0.10.0
libtpu: 0.0.40
codegen_flags: <defaults>
</compile_context>

<pallas_src>
import jax
import jax.numpy as jnp
from jax.experimental import pallas as pl
from jax.experimental.pallas import tpu as pltpu


def _make_group_kernel(*, K, L, Cin, HC, H, N, couts, mxu_dtype):
    """Build the fused kernel for a group of H heads, each num_conv == N."""
    pad = K // 2
    n_mid = max(N - 2, 0)
    has_l1 = N >= 2                      # shared first conv+BN+ReLU layer
    cprev = HC if has_l1 else Cin        # input channels of the final conv
    n_in = 1 + (3 if has_l1 else 0) + 3 * n_mid + 2

    def pad_rows(a):                     # (L, C) -> (L + 2*pad, C), zero rows
        z = jnp.zeros((pad, a.shape[1]), jnp.float32)
        return jnp.concatenate([z, a, z], axis=0)

    def im2col(ap):                      # (L + 2*pad, C) -> (L, K*C)
        return jnp.concatenate([ap[t:t + L, :] for t in range(K)], axis=1)

    def mm(a, b):                        # single MXU matmul, f32 accumulation
        return jnp.dot(a.astype(mxu_dtype), b.astype(mxu_dtype),
                       preferred_element_type=jnp.float32)

    def kernel(*refs):
        idx = 0
        x_ref = refs[idx]; idx += 1
        if has_l1:
            w1_ref, s1_ref, b1_ref = refs[idx:idx + 3]; idx += 3
        mid = []
        for _ in range(n_mid):
            mid.append(refs[idx:idx + 3]); idx += 3
        wf_ref, bf_ref = refs[idx:idx + 2]; idx += 2
        out_refs = refs[idx:]

        # input arrives NCL per batch element: (Cin, L) -> channels-last (L, Cin)
        x_lc = x_ref[...].astype(jnp.float32).T

        if has_l1:
            # layer 1: shared input, all heads concatenated on the lane axis
            im = im2col(pad_rows(x_lc))                       # (L, K*Cin)
            cur = mm(im, w1_ref[...])                         # (L, H*HC)
            cur = jnp.maximum(cur * s1_ref[...] + b1_ref[...], 0.0)
        else:
            cur = x_lc                                        # final conv reads x

        # intermediate per-head conv+BN+ReLU layers (num_conv > 2)
        for (wm_ref, sm_ref, bm_ref) in mid:
            wm = wm_ref[...]                                  # (H, K*HC, HC)
            curp = pad_rows(cur)
            parts = []
            for h in range(H):
                imh = im2col(curp[:, h * HC:(h + 1) * HC])    # (L, K*HC)
                parts.append(mm(imh, wm[h]))
            cur = jnp.concatenate(parts, axis=1)              # (L, H*HC)
            cur = jnp.maximum(cur * sm_ref[...] + bm_ref[...], 0.0)

        # final per-head conv with bias; write lane-dense NCL output (Cout, L)
        curp = pad_rows(cur)
        wf = wf_ref[...]                                      # (H, K*cprev, max_out)
        bf = bf_ref[...]                                      # (H, max_out)
        for h, o_ref in enumerate(out_refs):
            cout = couts[h]
            src = curp[:, h * cprev:(h + 1) * cprev] if has_l1 else curp
            imh = im2col(src)                                 # (L, K*cprev)
            y = mm(imh, wf[h, :, :cout]) + bf[h:h + 1, :cout]  # (L, cout)
            o_ref[...] = y.T.astype(o_ref.dtype)              # (cout, L)

    return kernel, n_in


def _run_group(x_ncl, group, mxu_dtype):
    """One fused pallas_call computing every head of the group."""
    B, Cin, L = x_ncl.shape
    K, HC, N = group['K'], group['HC'], group['num_conv']
    couts = tuple(group['couts'])
    H = len(couts)

    kernel, n_in = _make_group_kernel(K=K, L=L, Cin=Cin, HC=HC, H=H, N=N,
                                      couts=couts, mxu_dtype=mxu_dtype)

    def _const_spec(arr):   # weights: fetched once, resident across the B grid
        zeros = (0,) * arr.ndim
        return pl.BlockSpec(arr.shape, lambda b, z=zeros: z)

    inputs = [x_ncl]
    in_specs = [pl.BlockSpec((None, Cin, L), lambda b: (b, 0, 0))]
    if N >= 2:
        for arr in (group['w1'], group['s1'], group['b1']):
            inputs.append(arr); in_specs.append(_const_spec(arr))
    for (wm, sm, bm) in group['mids']:
        for arr in (wm, sm, bm):
            inputs.append(arr); in_specs.append(_const_spec(arr))
    for arr in (group['wf'], group['bf']):
        inputs.append(arr); in_specs.append(_const_spec(arr))
    assert len(inputs) == n_in

    out_shape = tuple(jax.ShapeDtypeStruct((B, c, L), x_ncl.dtype) for c in couts)
    out_specs = [pl.BlockSpec((None, c, L), lambda b: (b, 0, 0)) for c in couts]

    outs = pl.pallas_call(
        kernel,
        out_shape=out_shape,
        grid=(B,),
        in_specs=in_specs,
        out_specs=out_specs,
        compiler_params=pltpu.CompilerParams(
            dimension_semantics=("parallel",)),
    )(*inputs)
    return dict(zip(group['names'], outs))


class SeparateHeadTransfusion:
    """JAX/Pallas re-implementation of SeparateHead_Transfusion (forward)."""

    def __init__(self, input_channels, head_channels, kernel_size,
                 sep_head_dict, init_bias=-2.19, use_bias=False, seed=0,
                 mxu_dtype=jnp.float32):
        assert not use_bias, "intermediate conv bias not used (matches default)"
        assert kernel_size % 2 == 1, "odd kernel_size assumed (padding=K//2)"
        self.sep_head_dict = sep_head_dict
        self.kernel_size = kernel_size
        self.mxu_dtype = mxu_dtype
        eps = 1e-5
        # eval-mode BN with default params: gamma=1, beta=0, mean=0, var=1
        bn_scale_val = 1.0 / jnp.sqrt(1.0 + eps)

        key = jax.random.PRNGKey(seed)
        self.heads = {}
        for cur_name in sep_head_dict:
            out_ch = sep_head_dict[cur_name]['out_channels']
            num_conv = sep_head_dict[cur_name]['num_conv']
            layers = []
            in_c = input_channels
            for _ in range(num_conv - 1):
                key, wk = jax.random.split(key)
                w = jax.random.normal(
                    wk, (kernel_size, in_c, head_channels), jnp.float32
                ) * (2.0 / (in_c * kernel_size)) ** 0.5
                scale = jnp.full((head_channels,), bn_scale_val, jnp.float32)
                shift = jnp.zeros((head_channels,), jnp.float32)
                layers.append((w, scale, shift, True))       # relu=True
                in_c = head_channels
            key, wk, bk = jax.random.split(key, 3)
            w = jax.random.normal(
                wk, (kernel_size, in_c, out_ch), jnp.float32
            ) * (2.0 / (in_c * kernel_size)) ** 0.5
            if 'hm' in cur_name:
                bias = jnp.full((out_ch,), init_bias, jnp.float32)
            else:
                bound = 1.0 / (in_c * kernel_size) ** 0.5
                bias = jax.random.uniform(bk, (out_ch,), jnp.float32, -bound, bound)
            layers.append((w, jnp.ones((out_ch,), jnp.float32), bias, False))
            self.heads[cur_name] = layers

        # ---- fused parameters: heads grouped by num_conv, concatenated Cout ----
        K = kernel_size
        by_nc = {}
        for name in sep_head_dict:
            by_nc.setdefault(sep_head_dict[name]['num_conv'], []).append(name)
        self.groups = []
        for num_conv, names in by_nc.items():
            couts = [sep_head_dict[n]['out_channels'] for n in names]
            max_out = max(couts)
            group = {'names': names, 'num_conv': num_conv, 'couts': couts,
                     'K': K, 'HC': head_channels, 'mids': []}
            if num_conv >= 2:
                group['w1'] = jnp.concatenate(
                    [self.heads[n][0][0].reshape(K * input_channels, head_channels)
                     for n in names], axis=1)
                group['s1'] = jnp.concatenate(
                    [self.heads[n][0][1] for n in names]).reshape(1, -1)
                group['b1'] = jnp.concatenate(
                    [self.heads[n][0][2] for n in names]).reshape(1, -1)
                for li in range(1, num_conv - 1):
                    wm = jnp.stack(
                        [self.heads[n][li][0].reshape(K * head_channels, head_channels)
                         for n in names], axis=0)
                    sm = jnp.concatenate(
                        [self.heads[n][li][1] for n in names]).reshape(1, -1)
                    bm = jnp.concatenate(
                        [self.heads[n][li][2] for n in names]).reshape(1, -1)
                    group['mids'].append((wm, sm, bm))
                cprev = head_channels
            else:
                cprev = input_channels
            wf_list, bf_list = [], []
            for n, c in zip(names, couts):
                w = self.heads[n][num_conv - 1][0].reshape(K * cprev, c)
                b = self.heads[n][num_conv - 1][2]
                wf_list.append(jnp.pad(w, ((0, 0), (0, max_out - c))))
                bf_list.append(jnp.pad(b, ((0, max_out - c),)))
            group['wf'] = jnp.stack(wf_list, axis=0)          # (H, K*cprev, max_out)
            group['bf'] = jnp.stack(bf_list, axis=0)          # (H, max_out)
            self.groups.append(group)

    def __call__(self, x_ncl):
        ret = {}
        for group in self.groups:
            ret.update(_run_group(x_ncl, group, self.mxu_dtype))
        return ret


def _reference_head(x_ncl, layers, kernel_size):
    """Pure-JAX (XLA conv) reference for one head, NCL layout."""
    pad = kernel_size // 2
    h = x_ncl
    for (w_kio, scale, shift, relu) in layers:
        w_oik = jnp.transpose(w_kio, (2, 1, 0))  # (Cout, Cin, K)
        y = jax.lax.conv_general_dilated(
            h, w_oik, window_strides=(1,), padding=[(pad, pad)],
            dimension_numbers=('NCH', 'OIH', 'NCH'))
        y = y * scale[None, :, None] + shift[None, :, None]
        if relu:
            y = jnp.maximum(y, 0.0)
        h = y
    return h


if __name__ == "__main__":
    B, C_IN, HEAD_C, K, L = 2, 32, 32, 3, 16
    sep_head_dict = {
        'center': {'out_channels': 2, 'num_conv': 2},
        'dim': {'out_channels': 3, 'num_conv': 2},
        'hm': {'out_channels': 4, 'num_conv': 2},
    }

    module = SeparateHeadTransfusion(C_IN, HEAD_C, K, sep_head_dict, seed=0)

    x = jax.random.normal(jax.random.PRNGKey(0), (B, C_IN, L), jnp.float32)

    out = module(x)
    out = jax.tree_util.tree_map(jax.block_until_ready, out)

    # verify against a pure-JAX reference
    for name, layers in module.heads.items():
        ref = _reference_head(x, layers, K)
        got = out[name]
        assert got.shape == (B, sep_head_dict[name]['out_channels'], L), got.shape
        assert jnp.allclose(got, ref, atol=1e-4, rtol=1e-4), (
            f"mismatch in head {name}")

    print("KERNEL_OK")
</pallas_src>

<mosaic_0001>
module attributes {stable_mosaic.version = 11 : i64} {
  func.func @kernel(%arg0: i32, %arg1: memref<1x32x16xf32, #tpu.memory_space<vmem>>, %arg2: memref<96x96xf32, #tpu.memory_space<vmem>>, %arg3: memref<1x96xf32, #tpu.memory_space<vmem>>, %arg4: memref<1x96xf32, #tpu.memory_space<vmem>>, %arg5: memref<3x96x4xf32, #tpu.memory_space<vmem>>, %arg6: memref<3x4xf32, #tpu.memory_space<vmem>>, %arg7: memref<1x2x16xf32, #tpu.memory_space<vmem>>, %arg8: memref<1x3x16xf32, #tpu.memory_space<vmem>>, %arg9: memref<1x4x16xf32, #tpu.memory_space<vmem>>) attributes {dimension_semantics = [#tpu.dimension_semantics<parallel>], iteration_bounds = array<i64: 2>, scalar_prefetch = 0 : i64, scratch_operands = 0 : i64, tpu.core_type = #tpu.core_type<tc>, window_params = [{transform_indices = @transform_0, window_bounds = array<i64: 1, 32, 16>}, {pipeline_mode = #tpu.pipeline_mode<synchronous>, transform_indices = @transform_1, window_bounds = array<i64: 96, 96>}, {pipeline_mode = #tpu.pipeline_mode<synchronous>, transform_indices = @transform_2, window_bounds = array<i64: 1, 96>}, {pipeline_mode = #tpu.pipeline_mode<synchronous>, transform_indices = @transform_3, window_bounds = array<i64: 1, 96>}, {pipeline_mode = #tpu.pipeline_mode<synchronous>, transform_indices = @transform_4, window_bounds = array<i64: 3, 96, 4>}, {pipeline_mode = #tpu.pipeline_mode<synchronous>, transform_indices = @transform_5, window_bounds = array<i64: 3, 4>}, {transform_indices = @transform_6, window_bounds = array<i64: 1, 2, 16>}, {transform_indices = @transform_7, window_bounds = array<i64: 1, 3, 16>}, {transform_indices = @transform_8, window_bounds = array<i64: 1, 4, 16>}]} {
    %c0 = arith.constant 0 : index
    %c0_0 = arith.constant 0 : index
    %c0_1 = arith.constant 0 : index
    %0 = vector.load %arg1[%c0, %c0_0, %c0_1] : memref<1x32x16xf32, #tpu.memory_space<vmem>>, vector<1x32x16xf32>
    %1 = vector.shape_cast %0 : vector<1x32x16xf32> to vector<32x16xf32>
    %2 = tpu.transpose %1, [1, 0] : vector<32x16xf32> -> vector<16x32xf32>
    %cst = arith.constant 0.000000e+00 : f32
    %3 = vector.broadcast %cst : f32 to vector<1x32xf32>
    %4 = tpu.concatenate %3, %2, %3 in 0 : vector<1x32xf32>, vector<16x32xf32>, vector<1x32xf32> -> vector<18x32xf32>
    %5 = vector.extract_strided_slice %4 {offsets = [0, 0], sizes = [16, 32], strides = [1, 1]} : vector<18x32xf32> to vector<16x32xf32>
    %6 = vector.extract_strided_slice %4 {offsets = [1, 0], sizes = [16, 32], strides = [1, 1]} : vector<18x32xf32> to vector<16x32xf32>
    %7 = vector.extract_strided_slice %4 {offsets = [2, 0], sizes = [16, 32], strides = [1, 1]} : vector<18x32xf32> to vector<16x32xf32>
    %8 = tpu.concatenate %5, %6, %7 in 1 : vector<16x32xf32>, vector<16x32xf32>, vector<16x32xf32> -> vector<16x96xf32>
    %c0_2 = arith.constant 0 : index
    %c0_3 = arith.constant 0 : index
    %9 = vector.load %arg2[%c0_2, %c0_3] : memref<96x96xf32, #tpu.memory_space<vmem>>, vector<96x96xf32>
    %cst_4 = arith.constant dense<0.000000e+00> : vector<16x96xf32>
    %10 = tpu.matmul %8, %9, %cst_4 {dimension_numbers = #tpu.dot_dimension_numbers<[1], [0], [0], [1], [0, 0, 1, 1], [], []>} : vector<16x96xf32>, vector<96x96xf32>, vector<16x96xf32> -> vector<16x96xf32>
    %c0_5 = arith.constant 0 : index
    %c0_6 = arith.constant 0 : index
    %11 = vector.load %arg3[%c0_5, %c0_6] : memref<1x96xf32, #tpu.memory_space<vmem>>, vector<1x96xf32>
    %12 = vector.broadcast %11 : vector<1x96xf32> to vector<16x96xf32>
    %13 = arith.mulf %10, %12 : vector<16x96xf32>
    %c0_7 = arith.constant 0 : index
    %c0_8 = arith.constant 0 : index
    %14 = vector.load %arg4[%c0_7, %c0_8] : memref<1x96xf32, #tpu.memory_space<vmem>>, vector<1x96xf32>
    %15 = vector.broadcast %14 : vector<1x96xf32> to vector<16x96xf32>
    %16 = arith.addf %13, %15 : vector<16x96xf32>
    %cst_9 = arith.constant 0.000000e+00 : f32
    %17 = vector.broadcast %cst_9 : f32 to vector<16x96xf32>
    %18 = arith.maximumf %16, %17 : vector<16x96xf32>
    %cst_10 = arith.constant 0.000000e+00 : f32
    %19 = vector.broadcast %cst_10 : f32 to vector<1x96xf32>
    %20 = tpu.concatenate %19, %18, %19 in 0 : vector<1x96xf32>, vector<16x96xf32>, vector<1x96xf32> -> vector<18x96xf32>
    %c0_11 = arith.constant 0 : index
    %c0_12 = arith.constant 0 : index
    %c0_13 = arith.constant 0 : index
    %21 = vector.load %arg5[%c0_11, %c0_12, %c0_13] : memref<3x96x4xf32, #tpu.memory_space<vmem>>, vector<3x96x4xf32>
    %c0_14 = arith.constant 0 : index
    %c0_15 = arith.constant 0 : index
    %22 = vector.load %arg6[%c0_14, %c0_15] : memref<3x4xf32, #tpu.memory_space<vmem>>, vector<3x4xf32>
    %23 = vector.extract_strided_slice %20 {offsets = [0, 0], sizes = [18, 32], strides = [1, 1]} : vector<18x96xf32> to vector<18x32xf32>
    %24 = vector.extract_strided_slice %23 {offsets = [0, 0], sizes = [16, 32], strides = [1, 1]} : vector<18x32xf32> to vector<16x32xf32>
    %25 = vector.extract_strided_slice %23 {offsets = [1, 0], sizes = [16, 32], strides = [1, 1]} : vector<18x32xf32> to vector<16x32xf32>
    %26 = vector.extract_strided_slice %23 {offsets = [2, 0], sizes = [16, 32], strides = [1, 1]} : vector<18x32xf32> to vector<16x32xf32>
    %27 = tpu.concatenate %24, %25, %26 in 1 : vector<16x32xf32>, vector<16x32xf32>, vector<16x32xf32> -> vector<16x96xf32>
    %28 = vector.extract_strided_slice %21 {offsets = [0, 0, 0], sizes = [1, 96, 2], strides = [1, 1, 1]} : vector<3x96x4xf32> to vector<1x96x2xf32>
    %29 = vector.shape_cast %28 : vector<1x96x2xf32> to vector<96x2xf32>
    %cst_16 = arith.constant dense<0.000000e+00> : vector<16x2xf32>
    %30 = tpu.matmul %27, %29, %cst_16 {dimension_numbers = #tpu.dot_dimension_numbers<[1], [0], [0], [1], [0, 0, 1, 1], [], []>} : vector<16x96xf32>, vector<96x2xf32>, vector<16x2xf32> -> vector<16x2xf32>
    %31 = vector.extract_strided_slice %22 {offsets = [0, 0], sizes = [1, 2], strides = [1, 1]} : vector<3x4xf32> to vector<1x2xf32>
    %32 = vector.broadcast %31 : vector<1x2xf32> to vector<16x2xf32>
    %33 = arith.addf %30, %32 : vector<16x2xf32>
    %34 = tpu.transpose %33, [1, 0] : vector<16x2xf32> -> vector<2x16xf32>
    %c0_17 = arith.constant 0 : index
    %c0_18 = arith.constant 0 : index
    %c0_19 = arith.constant 0 : index
    %35 = vector.load %arg7[%c0_17, %c0_18, %c0_19] : memref<1x2x16xf32, #tpu.memory_space<vmem>>, vector<1x2x16xf32>
    %36 = vector.shape_cast %35 : vector<1x2x16xf32> to vector<2x16xf32>
    %37 = vector.shape_cast %34 : vector<2x16xf32> to vector<1x2x16xf32>
    tpu.vector_store %arg7[%c0_17, %c0_18, %c0_19], %37 {strides = array<i32>} : memref<1x2x16xf32, #tpu.memory_space<vmem>>, vector<1x2x16xf32>,
    %38 = vector.extract_strided_slice %20 {offsets = [0, 32], sizes = [18, 32], strides = [1, 1]} : vector<18x96xf32> to vector<18x32xf32>
    %39 = vector.extract_strided_slice %38 {offsets = [0, 0], sizes = [16, 32], strides = [1, 1]} : vector<18x32xf32> to vector<16x32xf32>
    %40 = vector.extract_strided_slice %38 {offsets = [1, 0], sizes = [16, 32], strides = [1, 1]} : vector<18x32xf32> to vector<16x32xf32>
    %41 = vector.extract_strided_slice %38 {offsets = [2, 0], sizes = [16, 32], strides = [1, 1]} : vector<18x32xf32> to vector<16x32xf32>
    %42 = tpu.concatenate %39, %40, %41 in 1 : vector<16x32xf32>, vector<16x32xf32>, vector<16x32xf32> -> vector<16x96xf32>
    %43 = vector.extract_strided_slice %21 {offsets = [1, 0, 0], sizes = [1, 96, 3], strides = [1, 1, 1]} : vector<3x96x4xf32> to vector<1x96x3xf32>
    %44 = vector.shape_cast %43 : vector<1x96x3xf32> to vector<96x3xf32>
    %cst_20 = arith.constant dense<0.000000e+00> : vector<16x3xf32>
    %45 = tpu.matmul %42, %44, %cst_20 {dimension_numbers = #tpu.dot_dimension_numbers<[1], [0], [0], [1], [0, 0, 1, 1], [], []>} : vector<16x96xf32>, vector<96x3xf32>, vector<16x3xf32> -> vector<16x3xf32>
    %46 = vector.extract_strided_slice %22 {offsets = [1, 0], sizes = [1, 3], strides = [1, 1]} : vector<3x4xf32> to vector<1x3xf32>
    %47 = vector.broadcast %46 : vector<1x3xf32> to vector<16x3xf32>
    %48 = arith.addf %45, %47 : vector<16x3xf32>
    %49 = tpu.transpose %48, [1, 0] : vector<16x3xf32> -> vector<3x16xf32>
    %c0_21 = arith.constant 0 : index
    %c0_22 = arith.constant 0 : index
    %c0_23 = arith.constant 0 : index
    %50 = vector.load %arg8[%c0_21, %c0_22, %c0_23] : memref<1x3x16xf32, #tpu.memory_space<vmem>>, vector<1x3x16xf32>
    %51 = vector.shape_cast %50 : vector<1x3x16xf32> to vector<3x16xf32>
    %52 = vector.shape_cast %49 : vector<3x16xf32> to vector<1x3x16xf32>
    tpu.vector_store %arg8[%c0_21, %c0_22, %c0_23], %52 {strides = array<i32>} : memref<1x3x16xf32, #tpu.memory_space<vmem>>, vector<1x3x16xf32>,
    %53 = vector.extract_strided_slice %20 {offsets = [0, 64], sizes = [18, 32], strides = [1, 1]} : vector<18x96xf32> to vector<18x32xf32>
    %54 = vector.extract_strided_slice %53 {offsets = [0, 0], sizes = [16, 32], strides = [1, 1]} : vector<18x32xf32> to vector<16x32xf32>
    %55 = vector.extract_strided_slice %53 {offsets = [1, 0], sizes = [16, 32], strides = [1, 1]} : vector<18x32xf32> to vector<16x32xf32>
    %56 = vector.extract_strided_slice %53 {offsets = [2, 0], sizes = [16, 32], strides = [1, 1]} : vector<18x32xf32> to vector<16x32xf32>
    %57 = tpu.concatenate %54, %55, %56 in 1 : vector<16x32xf32>, vector<16x32xf32>, vector<16x32xf32> -> vector<16x96xf32>
    %58 = vector.extract_strided_slice %21 {offsets = [2, 0, 0], sizes = [1, 96, 4], strides = [1, 1, 1]} : vector<3x96x4xf32> to vector<1x96x4xf32>
    %59 = vector.shape_cast %58 : vector<1x96x4xf32> to vector<96x4xf32>
    %cst_24 = arith.constant dense<0.000000e+00> : vector<16x4xf32>
    %60 = tpu.matmul %57, %59, %cst_24 {dimension_numbers = #tpu.dot_dimension_numbers<[1], [0], [0], [1], [0, 0, 1, 1], [], []>} : vector<16x96xf32>, vector<96x4xf32>, vector<16x4xf32> -> vector<16x4xf32>
    %61 = vector.extract_strided_slice %22 {offsets = [2, 0], sizes = [1, 4], strides = [1, 1]} : vector<3x4xf32> to vector<1x4xf32>
    %62 = vector.broadcast %61 : vector<1x4xf32> to vector<16x4xf32>
    %63 = arith.addf %60, %62 : vector<16x4xf32>
    %64 = tpu.transpose %63, [1, 0] : vector<16x4xf32> -> vector<4x16xf32>
    %c0_25 = arith.constant 0 : index
    %c0_26 = arith.constant 0 : index
    %c0_27 = arith.constant 0 : index
    %65 = vector.load %arg9[%c0_25, %c0_26, %c0_27] : memref<1x4x16xf32, #tpu.memory_space<vmem>>, vector<1x4x16xf32>
    %66 = vector.shape_cast %65 : vector<1x4x16xf32> to vector<4x16xf32>
    %67 = vector.shape_cast %64 : vector<4x16xf32> to vector<1x4x16xf32>
    tpu.vector_store %arg9[%c0_25, %c0_26, %c0_27], %67 {strides = array<i32>} : memref<1x4x16xf32, #tpu.memory_space<vmem>>, vector<1x4x16xf32>,
    return
  }
  func.func @transform_0(%arg0: i32) -> (i32, i32, i32) {
    %c0_i32 = arith.constant 0 : i32
    %c0_i32_0 = arith.constant 0 : i32
    %c0_i32_1 = arith.constant 0 : i32
    return %arg0, %c0_i32, %c0_i32_0 : i32, i32, i32
  }
  func.func @transform_1(%arg0: i32) -> (i32, i32) {
    %c0_i32 = arith.constant 0 : i32
    %c0_i32_0 = arith.constant 0 : i32
    %c0_i32_1 = arith.constant 0 : i32
    return %c0_i32, %c0_i32_0 : i32, i32
  }
  func.func @transform_2(%arg0: i32) -> (i32, i32) {
    %c0_i32 = arith.constant 0 : i32
    %c0_i32_0 = arith.constant 0 : i32
    %c0_i32_1 = arith.constant 0 : i32
    return %c0_i32, %c0_i32_0 : i32, i32
  }
  func.func @transform_3(%arg0: i32) -> (i32, i32) {
    %c0_i32 = arith.constant 0 : i32
    %c0_i32_0 = arith.constant 0 : i32
    %c0_i32_1 = arith.constant 0 : i32
    return %c0_i32, %c0_i32_0 : i32, i32
  }
  func.func @transform_4(%arg0: i32) -> (i32, i32, i32) {
    %c0_i32 = arith.constant 0 : i32
    %c0_i32_0 = arith.constant 0 : i32
    %c0_i32_1 = arith.constant 0 : i32
    %c0_i32_2 = arith.constant 0 : i32
    return %c0_i32, %c0_i32_0, %c0_i32_1 : i32, i32, i32
  }
  func.func @transform_5(%arg0: i32) -> (i32, i32) {
    %c0_i32 = arith.constant 0 : i32
    %c0_i32_0 = arith.constant 0 : i32
    %c0_i32_1 = arith.constant 0 : i32
    return %c0_i32, %c0_i32_0 : i32, i32
  }
  func.func @transform_6(%arg0: i32) -> (i32, i32, i32) {
    %c0_i32 = arith.constant 0 : i32
    %c0_i32_0 = arith.constant 0 : i32
    %c0_i32_1 = arith.constant 0 : i32
    return %arg0, %c0_i32, %c0_i32_0 : i32, i32, i32
  }
  func.func @transform_7(%arg0: i32) -> (i32, i32, i32) {
    %c0_i32 = arith.constant 0 : i32
    %c0_i32_0 = arith.constant 0 : i32
    %c0_i32_1 = arith.constant 0 : i32
    return %arg0, %c0_i32, %c0_i32_0 : i32, i32, i32
  }
  func.func @transform_8(%arg0: i32) -> (i32, i32, i32) {
    %c0_i32 = arith.constant 0 : i32
    %c0_i32_0 = arith.constant 0 : i32
    %c0_i32_1 = arith.constant 0 : i32
    return %arg0, %c0_i32, %c0_i32_0 : i32, i32, i32
  }
}

</mosaic_0001>

<bundles_post_ra>
// kernel: tpu_custom_call.1
= control target key start
LH: loop header
LB: loop body
LE: loop exit
PB: predicated region body
PF: predicated region fallthrough
CT: control target
= control target key end

     0   :  { %s2007_s0 = inlined_call_operand.vmem [shape: f32[2,32,16], index: 0, kind: input, shape index: {}]   ;;  %s2008_s1 = inlined_call_operand.vmem [shape: f32[96,96], index: 1, kind: input, shape index: {}]   ;;  %s2009_s2 = inlined_call_operand.vmem [shape: f32[1,96], index: 2, kind: input, shape index: {}]   ;;  %s2010_s3 = inlined_call_operand.vmem [shape: f32[1,96], index: 3, kind: input, shape index: {}]   ;;  %s2011_s4 = inlined_call_operand.vmem [shape: f32[3,96,4], index: 4, kind: input, shape index: {}]   ;;  %s2012_s5 = inlined_call_operand.vmem [shape: f32[3,4], index: 5, kind: input, shape index: {}]   ;;  %s2013_s6 = inlined_call_operand.hbm [shape: f32[2,2,16], index: 6, kind: output, shape index: {0}]   ;;  %s2014_s7 = inlined_call_operand.vmem [shape: f32[2,3,16], index: 7, kind: output, shape index: {1}]   ;;  %s2015_s8 = inlined_call_operand.hbm [shape: f32[2,4,16], index: 8, kind: output, shape index: {2}]  }
   0x1   :  { %2016 = sst [smem:[#allocation8_spill]] %s2007_s0 }
   0x2   :  { %2017 = sst [smem:[#allocation9_spill]] %s2008_s1 }
   0x3   :  { %2018 = sst [smem:[#allocation10_spill]] %s2009_s2 }
   0x4   :  { %14 = vsyncpa [#allocation3], 0 }
   0x5   :  { %16 = vsyncpa [#allocation3 + $0x1], 0 }
   0x6   :  { %17 = vsyncpa [#allocation5], 0 }
   0x7   :  { %19 = vsyncpa [#allocation5 + $0x1], 0  ;;  %s1620_s27 = smov 0   ;;  %s1622_s28 = smov 0  }
   0x8   :  { %s1624_s29 = smov 0   ;;  %s1626_s30 = smov 0  }
   0x9 LB: > { %s1641_s9 = sadd.s32 4294967295, %s1568_s30   ;;  %s1140_s10 = sadd.s32 4294967294, %s1568_s30   ;;  %s1568_s30 = sphi %s1626_s30, %s2027_s30   ;;  %s1564_s29 = sphi %s1624_s29, %s2026_s29   ;;  %s1560_s28 = sphi %s1622_s28, %s2025_s28   ;;  %s1556_s27 = sphi %s1620_s27, %s2024_s27  }
   0xa   : > { %s1645_s11 = sadd.s32 1, %s1568_s30   ;;  %s163_s12 = sadd.s32 1, %s1564_s29 }
   0xb   : > { %s160_s13 = ssub.s32 %s1568_s30, %s1645_s11  ;;  %p173_p0 = scmp.ne.s32.totalorder %s1564_s29, %s1560_s28 }
   0xc   : > { %p161_p1 = scmp.eq.s32.totalorder %s160_s13, 0  ;;  %p174_p2 = scmp.eq.s32.totalorder %s1641_s9, 1 }
   0xd   : > { %p179_p3 = scmp.ne.s32.totalorder %s1560_s28, %s1556_s27  ;;  %p180_p4 = scmp.eq.s32.totalorder %s1140_s10, 1 }
   0xe   : > { %s1656_s14 = scalar_select %p161_p1, %s1564_s29, %s163_s12  }
   0xf   : > { %p1658_p5 = por %p174_p2, %p173_p0  ;;  %p1662_p6 = por %p180_p4, %p179_p3 }
  0x10   : > { %p1143_p7 = scmp.ge.s32.totalorder %s1568_s30, 1  ;;  %p273_p8 = scmp.lt.s32.totalorder %s1568_s30, 3 }
  0x12   : > { %p274_p9 = pnand %p1143_p7, %p273_p8 }
  0x13   : > { %p316_p10 = scmp.lt.s32.totalorder (!%p274_p9), %s1641_s9, 1  ;;  %s2021_s0 = sld [smem:[#allocation8_spill]] (!%p274_p9)  ;;  %vm363_vm0 = vcmask (!%p274_p9), 1040384   ;;  %vm374_vm1 = vcmask (!%p274_p9), 1046528   ;;  %vm386_vm2 = vcmask (!%p274_p9), 1045504   ;;  %vm398_vm3 = vcmask (!%p274_p9), 261120  }
  0x14   : > { %277 = sbr.rel (%p274_p9) target bundleno = 1037 (0x40d), region = 44  ;;  %s2022_s1 = sld [smem:[#allocation9_spill]] (!%p274_p9)  ;;  %vm401_vm4 = vcmask (!%p274_p9), 523264   ;;  %vm416_vm5 = vcmask (!%p274_p9), 785408   ;;  %v528_v47 = vld [vmem:[%s2011_s4] sm:$0xff] (!%p274_p9)  ;;  %v529_v48 = vld [vmem:[%s2011_s4 + $0x8] sm:$0xff] (!%p274_p9) }
  0x15   : > { %s1570_s22 = smov (!%p274_p9), 32   ;;  %s1571_s23 = smov (!%p274_p9), 64   ;;  %v530_v49 = vld [vmem:[%s2011_s4 + $0x10] sm:$0xff] (!%p274_p9)  ;;  %v1354_v50 = vpack.c.bf16 (!%p274_p9), %v529_v48, %v528_v47  ;;  %v531_v51 = vld [vmem:[%s2011_s4 + $0x18] sm:$0xff] (!%p274_p9)  ;;  %v532_v53 = vld [vmem:[%s2011_s4 + $0x20] sm:$0xff] (!%p274_p9)  ;;  %vm710_vm6 = vcmask (!%p274_p9), 123904  }
  0x16   : > { %v1358_v52 = vpack.c.bf16 (!%p274_p9), %v531_v51, %v530_v49  ;;  %v533_v54 = vld [vmem:[%s2011_s4 + $0x28] sm:$0xff] (!%p274_p9)  ;;  %s2023_s2 = sld [smem:[#allocation10_spill]] (!%p274_p9)  ;;  %v534_v57 = vld [vmem:[%s2011_s4 + $0x30] sm:$0xff] (!%p274_p9)  ;;  %v535_v58 = vld [vmem:[%s2011_s4 + $0x38] sm:$0xff] (!%p274_p9)  ;;  %s1922_s19 = sand.u32 (!%p274_p9), 1, %s1560_s28  }
  0x17   : > { %1355 = vmatprep.subr.bf16.mxu1 (!%p274_p9), %v1354_v50  ;;  %v1362_v55 = vpack.c.bf16 (!%p274_p9), %v533_v54, %v532_v53  ;;  %v1152_v60 = vld [vmem:[%s2010_s3] ss:$0 sm:$0xff] (!%p274_p9)  ;;  %v1366_v61 = vpack.c.bf16 (!%p274_p9), %v535_v58, %v534_v57  ;;  %v554_v54 = vld [vmem:[%s2011_s4 + $0xd0] sm:$0xff] (!%p274_p9)  ;;  %s1144_s20 = sshll.u32 (!%p274_p9), %s1922_s19, 1  ;;  %s987_s26 = scalar_lea.sflag (!%p274_p9), [#allocation3], %s1922_s19 }
  0x18   : > { %1357 = vmatpush3.bf16.msra.mxu1 (!%p274_p9), %v1354_v50  ;;  %s1573_s12 = smov (!%p274_p9), [#allocation2]  }
  0x19   : > { %1359 = vmatprep.subr.bf16.mxu1 (!%p274_p9), %v1358_v52  ;;  %s1478_s13 = sshll.u32 (!%p274_p9), %s1573_s12, 4  ;;  %s1479_s13 = int_to_ptr.vmem [resolvable:$false] %s1478_s13 }
  0x1a   : > { %v404_v4 = vld [vmem:[%s2022_s1] sm:$0xff] (!%p274_p9)  ;;  %v405_v5 = vld [vmem:[%s2022_s1 + $0x8] sm:$0xff] (!%p274_p9)  ;;  %v406_v6 = vld [vmem:[%s2022_s1 + $0x10] sm:$0xff] (!%p274_p9) }
  0x1b   : > { %s1670_s17 = scalar_select %p316_p10, %s1641_s9, 1  ;;  %v1330_v7 = vpack.c.bf16 %v405_v5, %v404_v4  ;;  %v407_v8 = vld [vmem:[%s2022_s1 + $0x18] sm:$0xff]  ;;  %v408_v10 = vld [vmem:[%s2022_s1 + $0x20] sm:$0xff]  ;;  %v409_v11 = vld [vmem:[%s2022_s1 + $0x28] sm:$0xff] }
  0x1c   : > { %v1334_v9 = vpack.c.bf16 %v407_v8, %v406_v6  ;;  %v1338_v12 = vpack.c.bf16 %v409_v11, %v408_v10  ;;  %v410_v13 = vld [vmem:[%s2022_s1 + $0x30] sm:$0xff]  ;;  %v411_v14 = vld [vmem:[%s2022_s1 + $0x38] sm:$0xff]  ;;  %v412_v17 = vld [vmem:[%s2022_s1 + $0x40] sm:$0xff]  ;;  %1361 = vmatpush3.bf16.msra.mxu1 %v1358_v52 }
  0x1d   : > { %s1165_s18 = sshll.u32 %s1670_s17, 5  ;;  %1331 = vmatprep.subr.bf16.mxu0 %v1330_v7  ;;  %v1342_v15 = vpack.c.bf16 %v411_v14, %v410_v13  ;;  %v413_v18 = vld [vmem:[%s2022_s1 + $0x48] sm:$0xff]  ;;  %v414_v22 = vld [vmem:[%s2022_s1 + $0x50] sm:$0xff]  ;;  %v415_v23 = vld [vmem:[%s2022_s1 + $0x58] sm:$0xff]  ;;  %1363 = vmatprep.subr.bf16.mxu1 %v1362_v55 }
  0x1e   : > { %s320_s21 = scalar_lea.vmem %s2021_s0, %s1165_s18  ;;  %1333 = vmatpush3.bf16.msra.mxu0 %v1330_v7  ;;  %v1346_v20 = vpack.c.bf16 %v413_v18, %v412_v17  ;;  %v1350_v26 = vpack.c.bf16 %v415_v23, %v414_v22  ;;  %v1151_v56 = vld [vmem:[%s2023_s2] ss:$0 sm:$0xff]  ;;  %v539_v10 = vld [vmem:[%s2011_s4 + $0x58] sm:$0xff]  ;;  %v541_v22 = vld [vmem:[%s2011_s4 + $0x68] sm:$0xff]  ;;  %s1572_s18 = smov 96  }
  0x1f   : > { %v325_v0 = vld [vmem:[%s320_s21] sm:$0xff]  ;;  %v326_v1 = vld [vmem:[%s320_s21 + $0x8] sm:$0xff]  ;;  %v327_v2 = vld [vmem:[%s320_s21 + $0x10] sm:$0xff]  ;;  %1335 = vmatprep.subr.bf16.mxu0 %v1334_v9 }
  0x20   : > { %329 = vxpose.xlu0.b32.start [1/4] (short) (narrow) %v325_v0, 16  ;;  %v328_v3 = vld [vmem:[%s320_s21 + $0x18] sm:$0xff]  ;;  %1365 = vmatpush3.bf16.msra.mxu1 %v1362_v55  ;;  %v552_v18 = vld [vmem:[%s2011_s4 + $0xc0] sm:$0xff]  ;;  %s302_s21 = scalar_lea.vmem [#allocation2], %s1144_s20  ;;  %s1480_s20 = scalar_lea.vmem %s1479_s13, 64 }
  0x21   : > { %1367 = vmatprep.subr.bf16.mxu1 %v1366_v61  ;;  %v555_v55 = vld [vmem:[%s2011_s4 + $0xd8] sm:$0xff] }
  0x22   : > { %1337 = vmatpush3.bf16.msra.mxu0 %v1334_v9  ;;  %v538_v9 = vld [vmem:[%s2011_s4 + $0x50] sm:$0xff]  ;;  %v1406_v58 = vpack.c.bf16 %v555_v55, %v554_v54 }
  0x23   : > { %1339 = vmatprep.subr.bf16.mxu0 %v1338_v12 }
  0x24   : > { %330 = vxpose.xlu0.b32.cont [2/4] (short) (narrow) %v326_v1, 16  ;;  %1369 = vmatpush3.bf16.msra.mxu1 %v1366_v61  ;;  %v557_v61 = vld [vmem:[%s2011_s4 + $0xe8] sm:$0xff] }
  0x26   : > { %1341 = vmatpush3.bf16.msra.mxu0 %v1338_v12  ;;  %v1374_v12 = vpack.c.bf16 %v539_v10, %v538_v9  ;;  %v562_v9 = vld [vmem:[%s2011_s4 + $0x110] sm:$0xff]  ;;  %v563_v10 = vld [vmem:[%s2011_s4 + $0x118] sm:$0xff] }
  0x27   : > { %1343 = vmatprep.subr.bf16.mxu0 %v1342_v15 }
  0x28   : > { %331 = vxpose.xlu0.b32.cont [3/4] (short) (narrow) %v327_v2, 16  ;;  %v536_v2 = vld [vmem:[%s2011_s4 + $0x40] sm:$0xff] }
  0x2a   : > { %1345 = vmatpush3.bf16.msra.mxu0 %v1342_v15 }
  0x2b   : > { %1347 = vmatprep.subr.bf16.mxu0 %v1346_v20 }
  0x2c   : > { %332 = vxpose.xlu0.b32.end [4/4] (short) (narrow) %v328_v3, 16  ;;  %v537_v3 = vld [vmem:[%s2011_s4 + $0x48] sm:$0xff] }
  0x2d   : > { %v1370_v5 = vpack.c.bf16 %v537_v3, %v536_v2 }
  0x2e   : > { %1349 = vmatpush3.bf16.msra.mxu0 %v1346_v20 }
  0x2f   : > { %1351 = vmatprep.subr.bf16.mxu0 %v1350_v26  ;;  %1371 = vmatprep.subr.bf16.mxu1 %v1370_v5 }
  0x30   : > { %1373 = vmatpush3.bf16.msra.mxu1 %v1370_v5  ;;  %v561_v5 = vld [vmem:[%s2011_s4 + $0x108] sm:$0xff] }
  0x31   : > { %1375 = vmatprep.subr.bf16.mxu1 %v1374_v12 }
  0x32   : > { %1353 = vmatpush3.bf16.msra.mxu0 %v1350_v26  ;;  %v542_v26 = vld [vmem:[%s2011_s4 + $0x70] sm:$0xff] }
  0x34   : > { %1377 = vmatpush3.bf16.msra.mxu1 %v1374_v12 }
  0xa0   : > { %v345_v16 = vpop.trf.xlu0 }
  0xa1   : > { %v364_v19 = vrot.slane %v345_v16, 7 }
  0xa3   : > { %v370_v24 = vsel %vm363_vm0, 0.0, %v364_v19 }
  0xa4   : > { %v346_v21 = vpop.trf.xlu0  ;;  %v375_v29 = vrot.slane %v370_v24, 1  ;;  %v387_v35 = vrot.slane %v370_v24, 2 }
  0xa5   : > { %v365_v25 = vrot.slane %v346_v21, 7  ;;  %v540_v21 = vld [vmem:[%s2011_s4 + $0x60] sm:$0xff] }
  0xa7   : > { %v366_v27 = vsel %vm363_vm0, %v364_v19, %v365_v25  ;;  %v371_v28 = vsel %vm363_vm0, %v365_v25, 0.0  ;;  %v553_v19 = vld [vmem:[%s2011_s4 + $0xc8] sm:$0xff]  ;;  %v1378_v25 = vpack.c.bf16 %v541_v22, %v540_v21  ;;  %v593_v22 = vlaneseq }
  0xa8   : > { %v376_v30 = vrot.slane %v366_v27, 1  ;;  %v378_v31 = vrot.slane %v371_v28, 1  ;;  %v388_v34 = vrot.slane %v366_v27, 2  ;;  %v390_v36 = vrot.slane %v371_v28, 2 }
  0xa9   : > { %v1788_v20 = vpack.c.bf16 %v553_v19, %v552_v18  ;;  %1379 = vmatprep.subr.bf16.mxu0 %v1378_v25 }
  0xaa   : > { %v377_v32 = vsel %vm374_vm1, %v375_v29, %v376_v30  ;;  %v379_v33 = vsel %vm374_vm1, %v376_v30, %v378_v31  ;;  %v389_v37 = vsel %vm386_vm2, %v387_v35, %v388_v34  ;;  %v391_v38 = vsel %vm386_vm2, %v388_v34, %v390_v36 }
  0xab   : > { %380 = vrot.lane.b32.xlu1 %v377_v32, %s1570_s22  ;;  %1403 = vmatprep.subr.bf16.mxu1 %v1788_v20  ;;  %v544_v32 = vld [vmem:[%s2011_s4 + $0x80] sm:$0xff] }
  0xaf   : > { %382 = vrot.lane.b32.xlu1 %v379_v33, %s1570_s22  ;;  %v545_v33 = vld [vmem:[%s2011_s4 + $0x88] sm:$0xff] }
  0xb0   : > { %v1386_v36 = vpack.c.bf16 %v545_v33, %v544_v32 }
  0xb3   : > { %392 = vrot.lane.b32.xlu1 %v389_v37, %s1571_s23  ;;  %v546_v37 = vld [vmem:[%s2011_s4 + $0x90] sm:$0xff] }
  0xb7   : > { %394 = vrot.lane.b32.xlu1 %v391_v38, %s1571_s23  ;;  %v547_v38 = vld [vmem:[%s2011_s4 + $0x98] sm:$0xff] }
 0x11d   : > { %v381_v39 = vpop.permute.xlu1 %380 }
 0x11e   : > { %v399_v41 = vsel %vm398_vm3, %v370_v24, %v381_v39 }
 0x121   : > { %v383_v40 = vpop.permute.xlu1 %382 }
 0x122   : > { %v400_v44 = vsel %vm398_vm3, %v366_v27, %v383_v40  ;;  %v543_v27 = vld [vmem:[%s2011_s4 + $0x78] sm:$0xff]  ;;  %v1390_v40 = vpack.c.bf16 %v547_v38, %v546_v37 }
 0x123   : > { %v1382_v31 = vpack.c.bf16 %v543_v27, %v542_v26 }
 0x125   : > { %v393_v42 = vpop.permute.xlu1 %392 }
 0x126   : > { %v402_v43 = vsel %vm401_vm4, %v399_v41, %v393_v42  ;;  %v548_v41 = vld [vmem:[%s2011_s4 + $0xa0] sm:$0xff]  ;;  %v549_v42 = vld [vmem:[%s2011_s4 + $0xa8] sm:$0xff] }
 0x127   : > { %1246 = vmatprep.mubr.msk.f32.mxu0 %vm416_vm5, %v402_v43  ;;  %v1394_v43 = vpack.c.bf16 %v549_v42, %v548_v41 }
 0x129   : > { %v395_v45 = vpop.permute.xlu1 %394 }
 0x12a   : > { %v403_v46 = vsel %vm401_vm4, %v400_v44, %v395_v45  ;;  %v550_v44 = vld [vmem:[%s2011_s4 + $0xb0] sm:$0xff]  ;;  %v551_v45 = vld [vmem:[%s2011_s4 + $0xb8] sm:$0xff] }
 0x12b   : > { %1247 = vmatmul.mubr.msk.f32.vlgmr.msra.gmra.mrb[0].mxu0 %vm416_vm5, %v403_v46  ;;  %v1398_v46 = vpack.c.bf16 %v551_v45, %v550_v44 }
 0x12c   : > { %1381 = vmatpush3.bf16.msra.mxu0 %v1378_v25  ;;  %v564_v25 = vld [vmem:[%s2012_s5] sm:$0x7] }
 0x12d   : > { %1383 = vmatprep.subr.bf16.mxu0 %v1382_v31 }
 0x130   : > { %1385 = vmatpush3.bf16.msra.mxu0 %v1382_v31 }
 0x131   : > { %1387 = vmatprep.subr.bf16.mxu0 %v1386_v36 }
 0x134   : > { %1389 = vmatpush3.bf16.msra.mxu0 %v1386_v36 }
 0x135   : > { %1391 = vmatprep.subr.bf16.mxu0 %v1390_v40 }
 0x138   : > { %1393 = vmatpush3.bf16.msra.mxu0 %v1390_v40 }
 0x139   : > { %1395 = vmatprep.subr.bf16.mxu0 %v1394_v43 }
 0x13c   : > { %1397 = vmatpush3.bf16.msra.mxu0 %v1394_v43 }
 0x13d   : > { %1399 = vmatprep.subr.bf16.mxu0 %v1398_v46 }
 0x140   : > { %1401 = vmatpush3.bf16.msra.mxu0 %v1398_v46 }
 0x1fe   : > { %v1248_v59 = vpop.f32.mrb[0].mxu0 }
 0x1ff   : > { %v506_v62 = vmul.f32 %v1248_v59, %v1151_v56  ;;  %v489_v63 = vpop.f32.mrb[1].mxu0 }
 0x200   : > { %v505_v0 = vmul.f32 %v1151_v56, %v489_v63 }
 0x201   : > { %v515_v1 = vadd.f32 %v1152_v60, %v506_v62 }
 0x202   : > { %v514_v4 = vadd.f32 %v1152_v60, %v505_v0  ;;  %v556_v60 = vld [vmem:[%s2011_s4 + $0xe0] sm:$0xff]  ;;  %v558_v0 = vld [vmem:[%s2011_s4 + $0xf0] sm:$0xff] }
 0x203   : > { %v517_v6 = vmax.f32 %v515_v1, 0.0  ;;  %v1410_v63 = vpack.c.bf16 %v557_v61, %v556_v60  ;;  %v559_v1 = vld [vmem:[%s2011_s4 + $0xf8] sm:$0xff] }
 0x204   : > { %v516_v7 = vmax.f32 %v514_v4, 0.0  ;;  %v1414_v3 = vpack.c.bf16 %v559_v1, %v558_v0  ;;  %v560_v4 = vld [vmem:[%s2011_s4 + $0x100] sm:$0xff] }
 0x205   : > { %v521_v8 = vrot.slane %v517_v6, 7 }
 0x206   : > { %v520_v11 = vrot.slane %v516_v7, 7  ;;  %v1418_v7 = vpack.c.bf16 %v561_v5, %v560_v4 }
 0x207   : > { %v527_v15 = vsel %vm363_vm0, %v521_v8, 0.0 }
 0x208   : > { %v1772_v13 = vsel %vm363_vm0, %v520_v11, %v521_v8  ;;  %v1775_v14 = vsel %vm363_vm0, 0.0, %v520_v11  ;;  %v570_v24 = vrot.slane %v527_v15, 1  ;;  %v581_v35 = vrot.slane %v527_v15, 2 }
 0x209   : > { %849 = vrot.lane.b32.xlu1 %v1775_v14, %s1571_s23  ;;  %v567_v16 = vrot.slane %v1775_v14, 1  ;;  %v568_v17 = vrot.slane %v1772_v13, 1  ;;  %v578_v29 = vrot.slane %v1775_v14, 2  ;;  %v579_v30 = vrot.slane %v1772_v13, 2 }
 0x20b   : > { %v1797_v23 = vsel %vm374_vm1, %v567_v16, %v568_v17  ;;  %v1811_v28 = vsel %vm374_vm1, %v568_v17, %v570_v24  ;;  %v1824_v34 = vsel %vm386_vm2, %v578_v29, %v579_v30  ;;  %v1835_v39 = vsel %vm386_vm2, %v579_v30, %v581_v35 }
 0x20c   : > { %572 = vrot.lane.b32.xlu0 %v1797_v23, %s1570_s22 }
 0x20d   : > { %712 = vrot.lane.b32.xlu1 %v1775_v14, %s1572_s18 }
 0x211   : > { %574 = vrot.lane.b32.xlu1 %v1811_v28, %s1570_s22 }
 0x215   : > { %583 = vrot.lane.b32.xlu1 %v1824_v34, %s1571_s23 }
 0x219   : > { %585 = vrot.lane.b32.xlu1 %v1835_v39, %s1571_s23 }
 0x21d   : > { %851 = vrot.lane.b32.xlu1 %v1772_v13, %s1571_s23  ;;  %s1161_s23 = sshll.u32 %s1641_s9, 5 }
 0x21e   : > { %s1929_s25 = scalar_lea.hbm %s2013_s6, %s1161_s23 }
 0x221   : > { %714 = vrot.lane.b32.xlu1 %v1772_v13, %s1572_s18 }
 0x225   : > { %855 = vrot.lane.b32.xlu1 %v1797_v23, %s1572_s18 }
 0x229   : > { %857 = vrot.lane.b32.xlu1 %v1811_v28, %s1572_s18  ;;  %s1009_s18 = sshll.u32 %s302_s21, 4  ;;  %s1931_s18 = int_to_ptr.vmem [resolvable:$true] %s1009_s18 }
 0x22a   : > { %s1474_s10 = scalar_lea.vmem %s1931_s18, 32  ;;  %p1481_p0 = scmp.lt.s32.totalorder %s1931_s18, %s1479_s13 }
 0x22b   : > { %p1475_p11 = scmp.ne.s32.totalorder %s1931_s18, %s1474_s10  ;;  %p1482_p1 = scmp.lt.s32.totalorder %s1480_s20, %s1474_s10 }
 0x22d   : > { %720 = vrot.lane.b32.xlu1 %v1824_v34, %s1570_s22  ;;  %p1476_p12 = pnand %p1475_p11, %p1658_p5  ;;  %p1483_p2 = por %p1482_p1, %p1481_p0 }
 0x22f   : > { %p1477_p13 = pneg %p1476_p12 }
 0x231   : > { %722 = vrot.lane.b32.xlu1 %v1835_v39, %s1570_s22  ;;  %p1484_p3 = pnand %p1483_p2, %p1477_p13 }
 0x27b   : > { %v850_v47 = vpop.permute.xlu1 %849 }
 0x27e   : > { %v573_v50 = vpop.permute.xlu0 %572 }
 0x27f   : > { %v713_v48 = vpop.permute.xlu1 %712  ;;  %v589_v51 = vsel %vm398_vm3, %v1775_v14, %v573_v50 }
 0x280   : > { %v726_v14 = vsel %vm398_vm3, %v713_v48, %v1797_v23  ;;  %v594_v23 = vshrl.u32 %v593_v22, 7 }
 0x282   : > { %v595_v24 = vsub.s32 0, %v594_v23  ;;  %v869_v31 = vsub.s32 2, %v594_v23  ;;  %v732_v32 = vsub.s32 1, %v594_v23 }
 0x283   : > { %v575_v49 = vpop.permute.xlu1 %574 }
 0x284   : > { %v590_v56 = vsel %vm398_vm3, %v1772_v13, %v575_v49  ;;  %v1422_v13 = vpack.c.bf16 %v563_v10, %v562_v9  ;;  %v596_v26 = vrot.slane %v564_v25, %v595_v24  ;;  %v870_v33 = vrot.slane %v564_v25, %v869_v31 }
 0x287   : > { %v584_v52 = vpop.permute.xlu1 %583 }
 0x288   : > { %v591_v53 = vsel %vm401_vm4, %v589_v51, %v584_v52 }
 0x289   : > { %1273 = vmatprep.mubr.msk.f32.mxu1 %vm416_vm5, %v591_v53 }
 0x28b   : > { %v586_v57 = vpop.permute.xlu1 %585 }
 0x28c   : > { %v592_v59 = vsel %vm401_vm4, %v590_v56, %v586_v57 }
 0x28d   : > { %1274 = vmatmul.mubr.msk.f32.vlgmr.msra.gmra.mrb[0].mxu1 %vm416_vm5, %v592_v59 }
 0x28e   : > { %1405 = vmatpush3.bf16.msra.mxu1 %v1788_v20 }
 0x28f   : > { %v852_v62 = vpop.permute.xlu1 %851  ;;  %1407 = vmatprep.subr.bf16.mxu1 %v1406_v58 }
 0x292   : > { %1409 = vmatpush3.bf16.msra.mxu1 %v1406_v58 }
 0x293   : > { %v715_v2 = vpop.permute.xlu1 %714  ;;  %1411 = vmatprep.subr.bf16.mxu1 %v1410_v63 }
 0x294   : > { %v727_v18 = vsel %vm398_vm3, %v715_v2, %v1811_v28 }
 0x296   : > { %1413 = vmatpush3.bf16.msra.mxu1 %v1410_v63 }
 0x297   : > { %v856_v6 = vpop.permute.xlu1 %855  ;;  %1415 = vmatprep.subr.bf16.mxu1 %v1414_v3 }
 0x298   : > { %v863_v8 = vsel %vm398_vm3, %v850_v47, %v856_v6 }
 0x299   : > { %v865_v11 = vsel %vm401_vm4, %v863_v8, %v1824_v34  ;;  %v733_v34 = vrot.slane %v564_v25, %v732_v32 }
 0x29a   : > { %1417 = vmatpush3.bf16.msra.mxu1 %v1414_v3  ;;  %1327 = vmatprep.mubr.msk.f32.mxu1 %vm416_vm5, %v865_v11 }
 0x29b   : > { %v858_v12 = vpop.permute.xlu1 %857  ;;  %1419 = vmatprep.subr.bf16.mxu1 %v1418_v7 }
 0x29c   : > { %v864_v17 = vsel %vm398_vm3, %v852_v62, %v858_v12 }
 0x29d   : > { %v866_v20 = vsel %vm401_vm4, %v864_v17, %v1835_v39 }
 0x29e   : > { %1421 = vmatpush3.bf16.msra.mxu1 %v1418_v7 }
 0x29f   : > { %v721_v15 = vpop.permute.xlu1 %720  ;;  %1423 = vmatprep.subr.bf16.mxu1 %v1422_v13 }
 0x2a0   : > { %v728_v16 = vsel %vm401_vm4, %v726_v14, %v721_v15 }
 0x2a1   : > { %1300 = vmatprep.mubr.msk.f32.mxu0 %vm416_vm5, %v728_v16 }
 0x2a2   : > { %1425 = vmatpush3.bf16.msra.mxu1 %v1422_v13 }
 0x2a3   : > { %v723_v19 = vpop.permute.xlu1 %722 }
 0x2a4   : > { %v729_v21 = vsel %vm401_vm4, %v727_v18, %v723_v19 }
 0x2a5   : > { %1328 = vmatmul.mubr.msk.f32.vlgmr.msra.gmra.mrb[2].mxu1 %vm416_vm5, %v866_v20  ;;  %1301 = vmatmul.mubr.msk.f32.vlgmr.msra.gmra.mrb[2].mxu0 %vm416_vm5, %v729_v21 }
 0x360   : > { %v1275_v27 = vpop.f32.mrb[0].mxu1 }
 0x361   : > { %v669_v28 = vpop.f32.mrb[1].mxu1  ;;  %v675_v30 = vadd.f32 %v1275_v27, %v596_v26 }
 0x362   : > { %v670_v29 = vadd.f32 %v669_v28, %v596_v26 }
 0x364   : > { %678 = vxpose.xlu0.b32.start [1/2] (short) (narrow) %v670_v29, 8 }
 0x368   : > { %679 = vxpose.xlu0.b32.end [2/2] (short) (narrow) %v675_v30, 8 }
 0x378   : > { %v1329_v35 = vpop.f32.mrb[2].mxu1  ;;  %v1302_v36 = vpop.f32.mrb[2].mxu0 }
 0x379   : > { %v943_v37 = vpop.f32.mrb[3].mxu1  ;;  %v806_v38 = vpop.f32.mrb[3].mxu0  ;;  %v949_v41 = vadd.f32 %v1329_v35, %v870_v33  ;;  %v812_v42 = vadd.f32 %v1302_v36, %v733_v34 }
 0x37a   : > { %v944_v39 = vadd.f32 %v943_v37, %v870_v33  ;;  %v807_v40 = vadd.f32 %v806_v38, %v733_v34 }
 0x37c   : > { %952 = vxpose.xlu0.b32.start [1/2] (short) (narrow) %v944_v39, 8  ;;  %815 = vxpose.xlu1.b32.start [1/2] (short) (narrow) %v807_v40, 8 }
 0x380   : > { %953 = vxpose.xlu0.b32.end [2/2] (short) (narrow) %v949_v41, 8  ;;  %816 = vxpose.xlu1.b32.end [2/2] (short) (narrow) %v812_v42, 8 }
 0x3e4   : > { %v694_v43 = vpop.trf.xlu0 }
 0x3e5   : > { %711 = vst.msk [vmem:[%s302_s21] sm:$0x3] %vm710_vm6, %v694_v43 }
 0x3e6   : > { %1487 = shalt.err (!%p1484_p3)
}
 0x3e7   : > { %s1488_s23 = scalar_lea.hbm %s1929_s25, 32  ;;  %s1492_s22 = scalar_lea.hbm %s2013_s6, 64 }
 0x3e8   : > { %p1489_p4 = scmp.ne.s32.totalorder %s1929_s25, %s1488_s23  ;;  %p1493_p9 = scmp.lt.u32.totalorder %s1929_s25, %s2013_s6 }
 0x3e9   : > { %p1494_p10 = scmp.lt.u32.totalorder %s1492_s22, %s1488_s23  ;;  %p1496_p12 = scmp.lt.u32.totalorder %s1488_s23, %s1929_s25 }
 0x3ea   : > { %p1490_p7 = pnand %p1489_p4, %p1658_p5 }
 0x3eb   : > { %p1495_p11 = por %p1494_p10, %p1493_p9 }
 0x3ec   : > { %p1491_p8 = pneg %p1490_p7 }
 0x3ed   : > { %p1497_p13 = por %p1496_p12, %p1495_p11 }
 0x3ef   : > { %p1498_p0 = pnand %p1497_p13, %p1491_p8 }
 0x3f1   : > { %1501 = shalt.err (!%p1498_p0)
}
 0x3f2   : > { %1426 = dma.vmem_to_hbm [thread:$0]  (%p1658_p5), %s1931_s18, 32, %s1929_s25, %s987_s26   ;;  %vm984_vm7 = vcmask 125952   ;;  %vm847_vm8 = vcmask 124928  }
 0x3f3   : > { %s1145_s10 = sshll.u32 %s1922_s19, 2  ;;  %s1148_s20 = sshll.u32 %s1670_s17, 2 }
 0x3f4   : > { %s1162_s21 = sshll.u32 %s1641_s9, 6  ;;  %s315_s24 = scalar_lea.vmem [#allocation4], %s1145_s10 }
 0x3f5   : > { %s1025_s22 = sshll.u32 %s315_s24, 4  ;;  %s324_s13 = scalar_lea.vmem %s2014_s7, %s1148_s20  ;;  %s1966_s22 = int_to_ptr.vmem [resolvable:$true] %s1025_s22 }
 0x3f6   : > { %s1964_s2 = scalar_lea.hbm %s2015_s8, %s1162_s21  ;;  %s996_s9 = scalar_lea.sflag [#allocation5], %s1922_s19 }
 0x3f7   : > { %s1502_s17 = scalar_lea.vmem %s1966_s22, 64  ;;  %s1574_s18 = smov [#allocation4]  }
 0x3f8   : > { %p1503_p1 = scmp.ne.s32.totalorder %s1966_s22, %s1502_s17  ;;  %s1506_s25 = sshll.u32 %s1574_s18, 4  ;;  %s1507_s25 = int_to_ptr.vmem [resolvable:$false] %s1506_s25 }
 0x3f9   : > { %s1508_s0 = scalar_lea.vmem %s1507_s25, 128  ;;  %p1509_p4 = scmp.lt.s32.totalorder %s1966_s22, %s1507_s25 }
 0x3fa   : > { %p1504_p2 = pnand %p1503_p1, %p1658_p5  ;;  %p1510_p7 = scmp.lt.s32.totalorder %s1508_s0, %s1502_s17 }
 0x3fc   : > { %v968_v44 = vpop.trf.xlu0  ;;  %v831_v45 = vpop.trf.xlu1  ;;  %p1505_p3 = pneg %p1504_p2  ;;  %p1511_p8 = por %p1510_p7, %p1509_p4 }
 0x3fd   : > { %985 = vst.msk [vmem:[%s315_s24] sm:$0xf] %vm984_vm7, %v968_v44 }
 0x3fe   : > { %848 = vst.msk [vmem:[%s324_s13] sm:$0x7] %vm847_vm8, %v831_v45  ;;  %p1512_p9 = pnand %p1511_p8, %p1505_p3 }
 0x400   : > { %1515 = shalt.err (!%p1512_p9)
}
 0x401   : > { %s1516_s1 = scalar_lea.hbm %s1964_s2, 64  ;;  %s1520_s10 = scalar_lea.hbm %s2015_s8, 128 }
 0x402   : > { %p1517_p10 = scmp.ne.s32.totalorder %s1964_s2, %s1516_s1  ;;  %p1521_p13 = scmp.lt.u32.totalorder %s1964_s2, %s2015_s8 }
 0x403   : > { %p1522_p0 = scmp.lt.u32.totalorder %s1520_s10, %s1516_s1  ;;  %p1524_p2 = scmp.lt.u32.totalorder %s1516_s1, %s1964_s2 }
 0x404   : > { %p1518_p11 = pnand %p1517_p10, %p1658_p5 }
 0x405   : > { %p1523_p1 = por %p1522_p0, %p1521_p13 }
 0x406   : > { %p1519_p12 = pneg %p1518_p11 }
 0x407   : > { %p1525_p3 = por %p1524_p2, %p1523_p1 }
 0x409   : > { %p1526_p4 = pnand %p1525_p3, %p1519_p12 }
 0x40b   : > { %1529 = shalt.err (!%p1526_p4)
}
 0x40c   : > { %1427 = dma.vmem_to_hbm [thread:$0]  (%p1658_p5), %s1966_s22, 64, %s1964_s2, %s996_s9  }
 0x40d PF: > { %p1437_p7 = scmp.ge.s32.totalorder %s1568_s30, 2  ;;  %s1037_s24 = sand.u32 1, %s1556_s27  }
 0x40e   : > { %s1038_s23 = scalar_lea.sflag [#allocation3], %s1037_s24 }
 0x40f   : > { %p1431_p8 = pnand %p1437_p7, %p1662_p6 }
 0x411   : > { %1547 = dma.done.wait (!%p1431_p8), %s1038_s23, 32  }
 0x412   : > { %1549 = vsyncadd (!%p1431_p8), %s1038_s23, 4294967264  ;;  %s1054_s12 = scalar_lea.sflag [#allocation5], %s1037_s24 }
 0x413   : > { %1551 = dma.done.wait (!%p1431_p8), %s1054_s12, 64  }
 0x414   : > { %1553 = vsyncadd (!%p1431_p8), %s1054_s12, 4294967232  ;;  %p22_p5 = scmp.ge.s32.totalorder %s1645_s11, 4   ;;  %s2024_s27 = smov %s1560_s28 }
 0x415   : > { %s2025_s28 = smov %s1564_s29  ;;  %s2026_s29 = smov %s1656_s14 }
 0x416   : > { %s2027_s30 = smov %s1645_s11  ;;  %24 = sbr.rel (!%p22_p5) target bundleno = 9 (0x9), region = 108 }
 0x41d   :  { %1059 = vsyncpa [#allocation3], 1 }
 0x41e   :  { %1061 = vsyncpa [#allocation3 + $0x1], 1 }
 0x41f   :  { %1062 = vsyncpa [#allocation5], 1 }
 0x420   :  { %1064 = vsyncpa [#allocation5 + $0x1], 1 }

</bundles_post_ra>
